<compile_context>
chip_gen: v6e
topology: v6e:2x2x1
jax: 0.10.0
libtpu: 0.0.40
codegen_flags: <defaults>
</compile_context>

<pallas_src>
import math
import functools

import jax
import jax.numpy as jnp
from jax import lax
from jax.experimental import pallas as pl
from jax.experimental.pallas import tpu as pltpu


def _round_up(x, m):
    return ((x + m - 1) // m) * m


def shared_group_gru_kernel(
    xh_ref, gum_ref,
    w_ref, b_ref, seg_ref, exp_ref, fold_ref,
    out_ref,
    *, num_rules, rhp, inv_tau,
):
    f32 = jnp.float32
    R, P = num_rules, rhp

    xh = xh_ref[...]                                              # [Tb, I+H]

    # --- one packed matmul: all rules, all gates, q-tiled and h-tiled blocks ---
    pre = (jnp.dot(xh, w_ref[...], preferred_element_type=f32)
           + b_ref[...].astype(f32))                              # [Tb, 6*P]

    # divide-free sigmoid (EUP tanh only) on the fused r/z pre-activations
    rz = 0.5 * (jnp.tanh(0.5 * pre[:, 0:2 * P]) + 1.0)
    r_g = rz[:, 0:P]
    z_g = rz[:, P:2 * P]
    n_g = jnp.tanh(pre[:, 2 * P:3 * P] + r_g * pre[:, 3 * P:4 * P])
    q_t = pre[:, 4 * P:5 * P]                                     # q tiled per rule
    h_rep = pre[:, 5 * P:6 * P]                                   # h tiled per rule
    hnext_all = (1.0 - z_g) * n_g + z_g * h_rep                   # [Tb, P] (rule blocks)

    # --- attention logits: MXU segmented reduction over each rule's H lanes ---
    logits = jnp.dot((q_t * hnext_all).astype(seg_ref.dtype), seg_ref[...],
                     preferred_element_type=f32)                  # [Tb, R]

    # exact softmax (rows sum to 1; tiny tensor, off the critical path)
    m = jnp.max(logits, axis=-1, keepdims=True)
    e = jnp.exp(logits - m)
    sm = e / jnp.sum(e, axis=-1, keepdims=True)

    # gumbel_softmax(tau, hard=True): forward value is the hard one-hot
    noisy = (logits + gum_ref[...].astype(f32)) * inv_tau
    mx = jnp.max(noisy, axis=-1, keepdims=True)
    iota = lax.broadcasted_iota(jnp.int32, noisy.shape, 1).astype(f32)
    first_idx = jnp.min(jnp.where(noisy >= mx, iota, jnp.float32(R)),
                        axis=-1, keepdims=True)                   # argmax, first tie
    hard = (iota == first_idx).astype(f32)                        # [Tb, R] one-hot

    # --- select winning rule's hnext via MXU expand + fold (no lane slices) ---
    hard_exp = jnp.dot(hard.astype(exp_ref.dtype), exp_ref[...],
                       preferred_element_type=f32)                # [Tb, P]
    h_sel = jnp.dot((hard_exp * hnext_all).astype(fold_ref.dtype), fold_ref[...],
                    preferred_element_type=f32)                   # [Tb, H]

    # --- single merged output slab (hnew | sm | hard), written once ---
    out_ref[...] = jnp.concatenate([h_sel, sm, hard], axis=-1).astype(out_ref.dtype)


def shared_group_gru_forward(inp, h, gumbel, params, *, num_rules, tau=0.5,
                             block_rows=1024, matmul_dtype=jnp.float32):
    """inp:[N,K,I], h:[N,K,H], gumbel:[N,K,R] -> (h_new, attn_sm, attn_hard)."""
    N, K, I = inp.shape
    H = h.shape[-1]
    R = num_rules
    B = N * K
    RH = R * H
    RHp = _round_up(RH, 128)          # lane-aligned gate blocks for any (R, H)
    IH = I + H
    OUTW = H + 2 * R
    f32 = jnp.float32

    # ---------- one-time wrapper-side packing (pre-transposed, gate blocks) ----------
    def pack_cols(mats):              # list over rules of [rows, H] -> [rows, RHp]
        cat = jnp.concatenate(mats, axis=1).astype(f32)
        return jnp.pad(cat, ((0, 0), (0, RHp - RH)))

    def pack_bias(vecs):              # list over rules of [H] -> [RHp]
        cat = jnp.concatenate(vecs, axis=0).astype(f32)
        return jnp.pad(cat, (0, RHp - RH))

    wih_T = [params['w_ih'][r].T.astype(f32) for r in range(R)]   # [I, 3H]
    whh_T = [params['w_hh'][r].T.astype(f32) for r in range(R)]   # [H, 3H]
    z_i = jnp.zeros((I, RHp), f32)
    z_h = jnp.zeros((H, RHp), f32)
    eye_h = jnp.eye(H, dtype=f32)
    w_q = params['w_read'][0].astype(f32) @ params['w_write'].astype(f32)  # [H, H]

    w_pack = jnp.concatenate([
        # block 0: r-gate, x and h projections fused
        jnp.concatenate([pack_cols([wih_T[r][:, 0:H] for r in range(R)]),
                         pack_cols([whh_T[r][:, 0:H] for r in range(R)])], axis=0),
        # block 1: z-gate, fused
        jnp.concatenate([pack_cols([wih_T[r][:, H:2 * H] for r in range(R)]),
                         pack_cols([whh_T[r][:, H:2 * H] for r in range(R)])], axis=0),
        # block 2: n-gate input part
        jnp.concatenate([pack_cols([wih_T[r][:, 2 * H:3 * H] for r in range(R)]),
                         z_h], axis=0),
        # block 3: n-gate hidden part
        jnp.concatenate([z_i,
                         pack_cols([whh_T[r][:, 2 * H:3 * H] for r in range(R)])], axis=0),
        # block 4: q tiled per rule  (folds gll_read @ gll_write)
        jnp.concatenate([z_i, pack_cols([w_q] * R)], axis=0),
        # block 5: h tiled per rule  (replaces jnp.tile(h, (1, R)))
        jnp.concatenate([z_i, pack_cols([eye_h] * R)], axis=0),
    ], axis=1).astype(matmul_dtype)                                # [I+H, 6*RHp]

    b_pack = jnp.concatenate([
        pack_bias([params['b_ih'][r][0:H] + params['b_hh'][r][0:H] for r in range(R)]),
        pack_bias([params['b_ih'][r][H:2 * H] + params['b_hh'][r][H:2 * H] for r in range(R)]),
        pack_bias([params['b_ih'][r][2 * H:3 * H] for r in range(R)]),
        pack_bias([params['b_hh'][r][2 * H:3 * H] for r in range(R)]),
        jnp.zeros((2 * RHp,), f32),
    ])[None, :]                                                    # [1, 6*RHp]

    # tiny static matrices for MXU segmented reduce / expand / fold
    seg = jnp.pad(jnp.kron(jnp.eye(R, dtype=f32), jnp.ones((H, 1), f32)),
                  ((0, RHp - RH), (0, 0))).astype(matmul_dtype)    # [RHp, R]
    exp_m = jnp.pad(jnp.kron(jnp.eye(R, dtype=f32), jnp.ones((1, H), f32)),
                    ((0, 0), (0, RHp - RH))).astype(matmul_dtype)  # [R, RHp]
    fold = jnp.pad(jnp.tile(eye_h, (R, 1)),
                   ((0, RHp - RH), (0, 0))).astype(matmul_dtype)   # [RHp, H]

    # ---------- flatten rows, fuse x|h into one input slab, block into tiles ----------
    xh = jnp.concatenate([inp.reshape(B, I), h.reshape(B, H)],
                         axis=1).astype(matmul_dtype)              # [B, I+H]
    gf = gumbel.reshape(B, R).astype(f32)

    Tb = _round_up(max(int(block_rows), 8), 8)
    # keep >= 2 grid steps so the "parallel" axis can shard across v7x's 2 TCs
    # (harmless on single-TC v5e/v6e); Tb<=1024 also stays inside v5e's 16 MiB
    # scoped VMEM without raising vmem_limit_bytes.
    Tb = max(8, min(Tb, _round_up(max((B + 1) // 2, 1), 8)))
    B_pad = _round_up(B, Tb)
    if B_pad != B:
        xh = jnp.pad(xh, ((0, B_pad - B), (0, 0)))
        gf = jnp.pad(gf, ((0, B_pad - B), (0, 0)))

    kernel = functools.partial(
        shared_group_gru_kernel,
        num_rules=R, rhp=RHp, inv_tau=float(1.0 / tau))

    def row_spec(cols):
        return pl.BlockSpec((Tb, cols), lambda i: (i, 0))

    def full_spec(arr):
        return pl.BlockSpec(arr.shape, lambda i: (0, 0))

    out = pl.pallas_call(
        kernel,
        grid=(B_pad // Tb,),
        in_specs=[row_spec(IH), row_spec(R),
                  full_spec(w_pack), full_spec(b_pack),
                  full_spec(seg), full_spec(exp_m), full_spec(fold)],
        out_specs=pl.BlockSpec((Tb, OUTW), lambda i: (i, 0)),
        out_shape=jax.ShapeDtypeStruct((B_pad, OUTW), jnp.float32),
        compiler_params=pltpu.CompilerParams(
            dimension_semantics=("parallel",)),    # megacore sharding on v7x
    )(xh, gf, w_pack, b_pack, seg, exp_m, fold)

    h_new = out[:B, 0:H].astype(h.dtype).reshape(N, K, H)
    attn_sm = out[:B, H:H + R].reshape(N, K, R)
    attn_hard = out[:B, H + R:H + 2 * R].reshape(N, K, R)
    return h_new, attn_sm, attn_hard


# ------------------------- pure-JAX reference (PyTorch order) ----------------
def _gru_cell_ref(x, h, w_ih, w_hh, b_ih, b_hh):
    gi = x @ w_ih.T + b_ih
    gh = h @ w_hh.T + b_hh
    i_r, i_z, i_n = jnp.split(gi, 3, axis=-1)
    h_r, h_z, h_n = jnp.split(gh, 3, axis=-1)
    r = jax.nn.sigmoid(i_r + h_r)
    z = jax.nn.sigmoid(i_z + h_z)
    n = jnp.tanh(i_n + r * h_n)
    return (1.0 - z) * n + z * h


def shared_group_gru_ref(inp, h, gumbel, params, *, num_rules, tau=0.5):
    N, K, I = inp.shape
    H = h.shape[-1]
    B = N * K
    xf = inp.reshape(B, I)
    hf = h.reshape(B, H)
    gf = gumbel.reshape(B, num_rules)

    h_read = hf @ params['w_read'][0]                                # [B, key]
    hnext = jnp.stack(
        [_gru_cell_ref(xf, hf, params['w_ih'][r], params['w_hh'][r],
                       params['b_ih'][r], params['b_hh'][r])
         for r in range(num_rules)], axis=1)                         # [B, R, H]
    write_key = jnp.einsum('brh,kh->brk', hnext, params['w_write'])  # [B, R, key]
    att_logits = jnp.einsum('bk,brk->br', h_read, write_key)         # [B, R]

    noisy = (att_logits + gf) / tau
    y_hard = jax.nn.one_hot(jnp.argmax(noisy, axis=-1), num_rules, dtype=hf.dtype)
    h_sel = jnp.einsum('br,brh->bh', y_hard, hnext)
    attn_sm = jax.nn.softmax(att_logits, axis=-1)
    return (h_sel.reshape(N, K, H),
            attn_sm.reshape(N, K, num_rules),
            y_hard.reshape(N, K, num_rules))


if __name__ == "__main__":
    key = jax.random.PRNGKey(0)
    N, num_hidden = 2, 8
    input_size, hidden_size = 32, 32
    num_rules = 4
    key_size = 64                       # SharedGroupGRU.key_size
    tau = 0.5

    keys = jax.random.split(key, 4 * num_rules + 5)
    kit = iter(keys)

    def uni(k, shape, bound):
        return jax.random.uniform(k, shape, jnp.float32, -bound, bound)

    bound = 1.0 / math.sqrt(hidden_size)      # nn.GRUCell / nn.Linear init range
    params = {
        'w_ih': [uni(next(kit), (3 * hidden_size, input_size), bound)
                 for _ in range(num_rules)],
        'w_hh': [uni(next(kit), (3 * hidden_size, hidden_size), bound)
                 for _ in range(num_rules)],
        'b_ih': [uni(next(kit), (3 * hidden_size,), bound)
                 for _ in range(num_rules)],
        'b_hh': [uni(next(kit), (3 * hidden_size,), bound)
                 for _ in range(num_rules)],
        'w_read': 0.01 * jax.random.normal(
            next(kit), (1, hidden_size, key_size), jnp.float32),     # GroupLinearLayer
        'w_write': uni(next(kit), (key_size, hidden_size), bound),   # nn.Linear (no bias)
    }

    x = jax.random.normal(next(kit), (N, num_hidden, input_size), jnp.float32)
    h0 = jax.random.normal(next(kit), (N, num_hidden, hidden_size), jnp.float32)
    # TODO(synk): torch samples Gumbel noise inside F.gumbel_softmax; here it is
    # sampled host-side and passed in (forward hard-one-hot semantics preserved;
    # straight-through gradient is a backward-only concern).
    gumbel = jax.random.gumbel(next(kit), (N, num_hidden, num_rules), jnp.float32)

    h_new, attn_sm, attn_hard = shared_group_gru_forward(
        x, h0, gumbel, params, num_rules=num_rules, tau=tau)
    jax.block_until_ready((h_new, attn_sm, attn_hard))

    h_exp, sm_exp, hard_exp = shared_group_gru_ref(
        x, h0, gumbel, params, num_rules=num_rules, tau=tau)

    assert jnp.allclose(h_new, h_exp, rtol=2e-3, atol=2e-3), \
        float(jnp.max(jnp.abs(h_new - h_exp)))
    assert jnp.allclose(attn_sm, sm_exp, rtol=5e-3, atol=5e-3), \
        float(jnp.max(jnp.abs(attn_sm - sm_exp)))
    assert jnp.allclose(attn_hard, hard_exp, atol=1e-6), \
        float(jnp.max(jnp.abs(attn_hard - hard_exp)))
    print("KERNEL_OK")
</pallas_src>

<mosaic_0001>
module attributes {stable_mosaic.version = 11 : i64} {
  func.func @shared_group_gru_kernel(%arg0: i32, %arg1: memref<8x64xf32, #tpu.memory_space<vmem>>, %arg2: memref<8x4xf32, #tpu.memory_space<vmem>>, %arg3: memref<64x768xf32, #tpu.memory_space<vmem>>, %arg4: memref<1x768xf32, #tpu.memory_space<vmem>>, %arg5: memref<128x4xf32, #tpu.memory_space<vmem>>, %arg6: memref<4x128xf32, #tpu.memory_space<vmem>>, %arg7: memref<128x32xf32, #tpu.memory_space<vmem>>, %arg8: memref<8x40xf32, #tpu.memory_space<vmem>>) attributes {dimension_semantics = [#tpu.dimension_semantics<parallel>], iteration_bounds = array<i64: 2>, scalar_prefetch = 0 : i64, scratch_operands = 0 : i64, tpu.core_type = #tpu.core_type<tc>, window_params = [{transform_indices = @transform_0, window_bounds = array<i64: 8, 64>}, {transform_indices = @transform_1, window_bounds = array<i64: 8, 4>}, {pipeline_mode = #tpu.pipeline_mode<synchronous>, transform_indices = @transform_2, window_bounds = array<i64: 64, 768>}, {pipeline_mode = #tpu.pipeline_mode<synchronous>, transform_indices = @transform_3, window_bounds = array<i64: 1, 768>}, {pipeline_mode = #tpu.pipeline_mode<synchronous>, transform_indices = @transform_4, window_bounds = array<i64: 128, 4>}, {pipeline_mode = #tpu.pipeline_mode<synchronous>, transform_indices = @transform_5, window_bounds = array<i64: 4, 128>}, {pipeline_mode = #tpu.pipeline_mode<synchronous>, transform_indices = @transform_6, window_bounds = array<i64: 128, 32>}, {transform_indices = @transform_7, window_bounds = array<i64: 8, 40>}]} {
    %c0 = arith.constant 0 : index
    %c0_0 = arith.constant 0 : index
    %0 = vector.load %arg1[%c0, %c0_0] : memref<8x64xf32, #tpu.memory_space<vmem>>, vector<8x64xf32>
    %c0_1 = arith.constant 0 : index
    %c0_2 = arith.constant 0 : index
    %1 = vector.load %arg3[%c0_1, %c0_2] : memref<64x768xf32, #tpu.memory_space<vmem>>, vector<64x768xf32>
    %cst = arith.constant dense<0.000000e+00> : vector<8x768xf32>
    %2 = tpu.matmul %0, %1, %cst {dimension_numbers = #tpu.dot_dimension_numbers<[1], [0], [0], [1], [0, 0, 1, 1], [], []>} : vector<8x64xf32>, vector<64x768xf32>, vector<8x768xf32> -> vector<8x768xf32>
    %c0_3 = arith.constant 0 : index
    %c0_4 = arith.constant 0 : index
    %3 = vector.load %arg4[%c0_3, %c0_4] : memref<1x768xf32, #tpu.memory_space<vmem>>, vector<1x768xf32>
    %4 = vector.broadcast %3 : vector<1x768xf32> to vector<8x768xf32>
    %5 = arith.addf %2, %4 : vector<8x768xf32>
    %6 = vector.extract_strided_slice %5 {offsets = [0, 0], sizes = [8, 256], strides = [1, 1]} : vector<8x768xf32> to vector<8x256xf32>
    %cst_5 = arith.constant 5.000000e-01 : f32
    %7 = vector.broadcast %cst_5 : f32 to vector<8x256xf32>
    %8 = arith.mulf %7, %6 : vector<8x256xf32>
    %9 = math.tanh %8 : vector<8x256xf32>
    %cst_6 = arith.constant 1.000000e+00 : f32
    %10 = vector.broadcast %cst_6 : f32 to vector<8x256xf32>
    %11 = arith.addf %9, %10 : vector<8x256xf32>
    %cst_7 = arith.constant 5.000000e-01 : f32
    %12 = vector.broadcast %cst_7 : f32 to vector<8x256xf32>
    %13 = arith.mulf %12, %11 : vector<8x256xf32>
    %14 = vector.extract_strided_slice %13 {offsets = [0, 0], sizes = [8, 128], strides = [1, 1]} : vector<8x256xf32> to vector<8x128xf32>
    %15 = vector.extract_strided_slice %13 {offsets = [0, 128], sizes = [8, 128], strides = [1, 1]} : vector<8x256xf32> to vector<8x128xf32>
    %16 = vector.extract_strided_slice %5 {offsets = [0, 256], sizes = [8, 128], strides = [1, 1]} : vector<8x768xf32> to vector<8x128xf32>
    %17 = vector.extract_strided_slice %5 {offsets = [0, 384], sizes = [8, 128], strides = [1, 1]} : vector<8x768xf32> to vector<8x128xf32>
    %18 = arith.mulf %14, %17 : vector<8x128xf32>
    %19 = arith.addf %16, %18 : vector<8x128xf32>
    %20 = math.tanh %19 : vector<8x128xf32>
    %21 = vector.extract_strided_slice %5 {offsets = [0, 512], sizes = [8, 128], strides = [1, 1]} : vector<8x768xf32> to vector<8x128xf32>
    %22 = vector.extract_strided_slice %5 {offsets = [0, 640], sizes = [8, 128], strides = [1, 1]} : vector<8x768xf32> to vector<8x128xf32>
    %cst_8 = arith.constant 1.000000e+00 : f32
    %23 = vector.broadcast %cst_8 : f32 to vector<8x128xf32>
    %24 = arith.subf %23, %15 : vector<8x128xf32>
    %25 = arith.mulf %24, %20 : vector<8x128xf32>
    %26 = arith.mulf %15, %22 : vector<8x128xf32>
    %27 = arith.addf %25, %26 : vector<8x128xf32>
    %28 = arith.mulf %21, %27 : vector<8x128xf32>
    %c0_9 = arith.constant 0 : index
    %c0_10 = arith.constant 0 : index
    %29 = vector.load %arg5[%c0_9, %c0_10] : memref<128x4xf32, #tpu.memory_space<vmem>>, vector<128x4xf32>
    %cst_11 = arith.constant dense<0.000000e+00> : vector<8x4xf32>
    %30 = tpu.matmul %28, %29, %cst_11 {dimension_numbers = #tpu.dot_dimension_numbers<[1], [0], [0], [1], [0, 0, 1, 1], [], []>} : vector<8x128xf32>, vector<128x4xf32>, vector<8x4xf32> -> vector<8x4xf32>
    %cst_12 = arith.constant dense<0xFF800000> : vector<8xf32>
    %31 = vector.multi_reduction <maximumf>, %30, %cst_12 [1] : vector<8x4xf32> to vector<8xf32>
    %32 = vector.shape_cast %31 : vector<8xf32> to vector<8x1xf32>
    %33 = vector.broadcast %32 : vector<8x1xf32> to vector<8x4xf32>
    %34 = arith.subf %30, %33 : vector<8x4xf32>
    %35 = math.exp %34 : vector<8x4xf32>
    %cst_13 = arith.constant dense<0.000000e+00> : vector<8xf32>
    %36 = vector.multi_reduction <add>, %35, %cst_13 [1] : vector<8x4xf32> to vector<8xf32>
    %37 = vector.shape_cast %36 : vector<8xf32> to vector<8x1xf32>
    %38 = vector.broadcast %37 : vector<8x1xf32> to vector<8x4xf32>
    %39 = arith.divf %35, %38 : vector<8x4xf32>
    %c0_14 = arith.constant 0 : index
    %c0_15 = arith.constant 0 : index
    %40 = vector.load %arg2[%c0_14, %c0_15] : memref<8x4xf32, #tpu.memory_space<vmem>>, vector<8x4xf32>
    %41 = arith.addf %30, %40 : vector<8x4xf32>
    %cst_16 = arith.constant 2.000000e+00 : f32
    %42 = vector.broadcast %cst_16 : f32 to vector<8x4xf32>
    %43 = arith.mulf %41, %42 : vector<8x4xf32>
    %cst_17 = arith.constant dense<0xFF800000> : vector<8xf32>
    %44 = vector.multi_reduction <maximumf>, %43, %cst_17 [1] : vector<8x4xf32> to vector<8xf32>
    %45 = vector.shape_cast %44 : vector<8xf32> to vector<8x1xf32>
    %46 = tpu.iota {dimensions = array<i32: 1>} : vector<8x4xi32>
    %47 = arith.sitofp %46 : vector<8x4xi32> to vector<8x4xf32>
    %48 = vector.broadcast %45 : vector<8x1xf32> to vector<8x4xf32>
    %49 = arith.cmpf oge, %43, %48 : vector<8x4xf32>
    %cst_18 = arith.constant 4.000000e+00 : f32
    %50 = vector.broadcast %cst_18 : f32 to vector<8x4xf32>
    %51 = arith.select %49, %47, %50 : vector<8x4xi1>, vector<8x4xf32>
    %cst_19 = arith.constant dense<0x7F800000> : vector<8xf32>
    %52 = vector.multi_reduction <minimumf>, %51, %cst_19 [1] : vector<8x4xf32> to vector<8xf32>
    %53 = vector.shape_cast %52 : vector<8xf32> to vector<8x1xf32>
    %54 = vector.broadcast %53 : vector<8x1xf32> to vector<8x4xf32>
    %55 = arith.cmpf oeq, %47, %54 : vector<8x4xf32>
    %56 = arith.extui %55 : vector<8x4xi1> to vector<8x4xi32>
    %57 = arith.sitofp %56 : vector<8x4xi32> to vector<8x4xf32>
    %c0_20 = arith.constant 0 : index
    %c0_21 = arith.constant 0 : index
    %58 = vector.load %arg6[%c0_20, %c0_21] : memref<4x128xf32, #tpu.memory_space<vmem>>, vector<4x128xf32>
    %cst_22 = arith.constant dense<0.000000e+00> : vector<8x128xf32>
    %59 = tpu.matmul %57, %58, %cst_22 {dimension_numbers = #tpu.dot_dimension_numbers<[1], [0], [0], [1], [0, 0, 1, 1], [], []>} : vector<8x4xf32>, vector<4x128xf32>, vector<8x128xf32> -> vector<8x128xf32>
    %60 = arith.mulf %59, %27 : vector<8x128xf32>
    %c0_23 = arith.constant 0 : index
    %c0_24 = arith.constant 0 : index
    %61 = vector.load %arg7[%c0_23, %c0_24] : memref<128x32xf32, #tpu.memory_space<vmem>>, vector<128x32xf32>
    %cst_25 = arith.constant dense<0.000000e+00> : vector<8x32xf32>
    %62 = tpu.matmul %60, %61, %cst_25 {dimension_numbers = #tpu.dot_dimension_numbers<[1], [0], [0], [1], [0, 0, 1, 1], [], []>} : vector<8x128xf32>, vector<128x32xf32>, vector<8x32xf32> -> vector<8x32xf32>
    %63 = tpu.concatenate %62, %39, %57 in 1 : vector<8x32xf32>, vector<8x4xf32>, vector<8x4xf32> -> vector<8x40xf32>
    %c0_26 = arith.constant 0 : index
    %c0_27 = arith.constant 0 : index
    %64 = vector.load %arg8[%c0_26, %c0_27] : memref<8x40xf32, #tpu.memory_space<vmem>>, vector<8x40xf32>
    tpu.vector_store %arg8[%c0_26, %c0_27], %63 {strides = array<i32>} : memref<8x40xf32, #tpu.memory_space<vmem>>, vector<8x40xf32>,
    return
  }
  func.func @transform_0(%arg0: i32) -> (i32, i32) {
    %c0_i32 = arith.constant 0 : i32
    %c0_i32_0 = arith.constant 0 : i32
    return %arg0, %c0_i32 : i32, i32
  }
  func.func @transform_1(%arg0: i32) -> (i32, i32) {
    %c0_i32 = arith.constant 0 : i32
    %c0_i32_0 = arith.constant 0 : i32
    return %arg0, %c0_i32 : i32, i32
  }
  func.func @transform_2(%arg0: i32) -> (i32, i32) {
    %c0_i32 = arith.constant 0 : i32
    %c0_i32_0 = arith.constant 0 : i32
    %c0_i32_1 = arith.constant 0 : i32
    return %c0_i32, %c0_i32_0 : i32, i32
  }
  func.func @transform_3(%arg0: i32) -> (i32, i32) {
    %c0_i32 = arith.constant 0 : i32
    %c0_i32_0 = arith.constant 0 : i32
    %c0_i32_1 = arith.constant 0 : i32
    return %c0_i32, %c0_i32_0 : i32, i32
  }
  func.func @transform_4(%arg0: i32) -> (i32, i32) {
    %c0_i32 = arith.constant 0 : i32
    %c0_i32_0 = arith.constant 0 : i32
    %c0_i32_1 = arith.constant 0 : i32
    return %c0_i32, %c0_i32_0 : i32, i32
  }
  func.func @transform_5(%arg0: i32) -> (i32, i32) {
    %c0_i32 = arith.constant 0 : i32
    %c0_i32_0 = arith.constant 0 : i32
    %c0_i32_1 = arith.constant 0 : i32
    return %c0_i32, %c0_i32_0 : i32, i32
  }
  func.func @transform_6(%arg0: i32) -> (i32, i32) {
    %c0_i32 = arith.constant 0 : i32
    %c0_i32_0 = arith.constant 0 : i32
    %c0_i32_1 = arith.constant 0 : i32
    return %c0_i32, %c0_i32_0 : i32, i32
  }
  func.func @transform_7(%arg0: i32) -> (i32, i32) {
    %c0_i32 = arith.constant 0 : i32
    %c0_i32_0 = arith.constant 0 : i32
    return %arg0, %c0_i32 : i32, i32
  }
}

</mosaic_0001>

<bundles_post_ra>
// kernel: tpu_custom_call.1
= control target key start
LH: loop header
LB: loop body
LE: loop exit
PB: predicated region body
PF: predicated region fallthrough
CT: control target
= control target key end

     0   :  { %12 = vsyncpa [#allocation3], 0  ;;  %s1630_s0 = inlined_call_operand.vmem [shape: f32[16,64], index: 0, kind: input, shape index: {}]   ;;  %s1631_s1 = inlined_call_operand.vmem [shape: f32[16,4], index: 1, kind: input, shape index: {}]   ;;  %s1632_s2 = inlined_call_operand.hbm [shape: f32[64,768], index: 2, kind: input, shape index: {}]   ;;  %s1633_s3 = inlined_call_operand.vmem [shape: f32[1,768], index: 3, kind: input, shape index: {}]   ;;  %s1634_s4 = inlined_call_operand.vmem [shape: f32[128,4], index: 4, kind: input, shape index: {}]   ;;  %s1635_s5 = inlined_call_operand.vmem [shape: f32[4,128], index: 5, kind: input, shape index: {}]   ;;  %s1636_s6 = inlined_call_operand.vmem [shape: f32[128,32], index: 6, kind: input, shape index: {}]   ;;  %s1637_s7 = inlined_call_operand.hbm [shape: f32[16,40], index: 7, kind: output, shape index: {}]  }
   0x1   :  { %13 = vsyncpa [#allocation4], 0 }
   0x2   :  { %15 = vsyncpa [#allocation4 + $0x1], 0  ;;  %s1346_s24 = smov 0   ;;  %s1348_s25 = smov 0  }
   0x3   :  { %s1350_s26 = smov 0   ;;  %s1352_s27 = smov 0  }
   0x4 LB: > { %s1367_s28 = sadd.s32 4294967295, %s1296_s27   ;;  %s1010_s29 = sadd.s32 4294967294, %s1296_s27   ;;  %s1296_s27 = sphi %s1352_s27, %s1645_s27   ;;  %s1292_s26 = sphi %s1350_s26, %s1644_s26   ;;  %s1288_s25 = sphi %s1348_s25, %s1643_s25   ;;  %s1284_s24 = sphi %s1346_s24, %s1642_s24  }
   0x5   : > { %s1371_s30 = sadd.s32 1, %s1296_s27   ;;  %s185_s8 = sadd.s32 1, %s1292_s26 }
   0x6   : > { %s182_s9 = ssub.s32 %s1296_s27, %s1371_s30  ;;  %p195_p0 = scmp.ne.s32.totalorder %s1292_s26, %s1288_s25 }
   0x7   : > { %p183_p1 = scmp.eq.s32.totalorder %s182_s9, 0  ;;  %p196_p2 = scmp.eq.s32.totalorder %s1367_s28, 1 }
   0x8   : > { %p201_p3 = scmp.ne.s32.totalorder %s1288_s25, %s1284_s24  ;;  %p202_p4 = scmp.eq.s32.totalorder %s1010_s29, 1 }
   0x9   : > { %s1382_s10 = scalar_select %p183_p1, %s1292_s26, %s185_s8  }
   0xa   : > { %p1384_p5 = por %p196_p2, %p195_p0  ;;  %p1388_p6 = por %p202_p4, %p201_p3 }
   0xb   : > { %p1011_p7 = scmp.ge.s32.totalorder %s1296_s27, 1  ;;  %p209_p8 = scmp.lt.s32.totalorder %s1296_s27, 3 }
   0xc   : > { %s1639_s12 = scalar_select %p1388_p6, 1, 0 }
   0xd   : > { %p1154_p9 = scmp.eq.s32.totalorder %s1367_s28, 0  ;;  %p1395_p10 = pnand %p1011_p7, %p209_p8 }
   0xe   : > { %s1298_s14 = smov [#allocation2]  }
   0xf   : > { %s221_s15 = sshll.u32 %s1298_s14, 4  ;;  %p1146_p11 = pneg %p1395_p10  ;;  %s222_s15 = int_to_ptr.vmem [resolvable:$true] %s221_s15 }
  0x10   : > { %s1217_s16 = scalar_lea.vmem %s222_s15, 6144  ;;  %p1225_p3 = scmp.lt.s32.totalorder %s222_s15, %s222_s15 }
  0x11   : > { %p1147_p12 = pnand %p1154_p9, %p1146_p11  ;;  %p1218_p0 = scmp.ne.s32.totalorder %s222_s15, %s1217_s16 }
  0x12   : > { %p1226_p4 = scmp.lt.s32.totalorder %s1217_s16, %s1217_s16 }
  0x13   : > { %p1208_p13 = pneg %p1147_p12 }
  0x14   : > { %p1227_p6 = por %p1226_p4, %p1225_p3 }
  0x15   : > { %p1220_p1 = pnand %p1218_p0, %p1208_p13 }
  0x17   : > { %p1221_p2 = pneg %p1220_p1 }
  0x19   : > { %p1228_p7 = pnand %p1227_p6, %p1221_p2 }
  0x1b   : > { %1231 = shalt.err (!%p1228_p7)
}
  0x1c   : > { %s1299_s17 = smov 768   ;;  %s1300_s18 = smov 48  }
  0x1d   : > { %1149 = dma.hbm_to_vmem [thread:$0]  (!%p1147_p12), %s1632_s2, 6144, %s222_s15, [#allocation3], %s1299_s17, %s1299_s17, %s1300_s18  }
  0x1e   : > { %263 = sbr.rel (%p1395_p10) target bundleno = 1175 (0x497), region = 48 }
  0x23   : > { %1275 = dma.done.wait (%p1154_p9), [#allocation3], 6144  }
  0x24   : > { %1277 = vsyncadd (%p1154_p9), [#allocation3], 4294961152  ;;  %v1301_v0 = vmov 0.0   ;;  %v350_v1 = vld [vmem:[#allocation2 + $0x158] sm:$0xff]  ;;  %v349_v2 = vld [vmem:[#allocation2 + $0x150] sm:$0xff]  ;;  %p298_p6 = scmp.lt.s32.totalorder %s1367_s28, 1 }
  0x25   : > { %455 = vmatprep.mubr.f32.mxu1 %v1301_v0  ;;  %597 = vmatprep.mubr.f32.mxu0 %v1301_v0  ;;  %v344_v3 = vld [vmem:[#allocation2 + $0x128] sm:$0xff]  ;;  %v343_v4 = vld [vmem:[#allocation2 + $0x120] sm:$0xff]  ;;  %v338_v5 = vld [vmem:[#allocation2 + $0xf8] sm:$0xff]  ;;  %vm387_vm0 = vcmask 523264   ;;  %vm1302_vm1 = vmmov 0   ;;  %vm706_vm2 = vcmask 31744  }
  0x26   : > { %407 = vmatprep.subr.mxu1 %v350_v1  ;;  %v337_v6 = vld [vmem:[#allocation2 + $0xf0] sm:$0xff]  ;;  %v332_v7 = vld [vmem:[#allocation2 + $0xc8] sm:$0xff]  ;;  %s1416_s21 = scalar_select %p298_p6, %s1367_s28, 1  ;;  %v331_v8 = vld [vmem:[#allocation2 + $0xc0] sm:$0xff]  ;;  %vm739_vm3 = vcmask 1043456   ;;  %vm907_vm6 = vcmask 261120  }
  0x27   : > { %408 = vmatpush1.msra.mxu1 %v349_v2  ;;  %v326_v9 = vld [vmem:[#allocation2 + $0x98] sm:$0xff]  ;;  %v325_v10 = vld [vmem:[#allocation2 + $0x90] sm:$0xff]  ;;  %v320_v12 = vld [vmem:[#allocation2 + $0x68] sm:$0xff]  ;;  %s1304_s16 = smov 32   ;;  %s295_s19 = sand.u32 1, %s1288_s25   ;;  %vm909_vm7 = vcmask 293888  }
  0x28   : > { %409 = vmatprep.subr.mxu1 %v344_v3  ;;  %v354_v11 = vld [vmem:[#allocation2 + $0x178] sm:$0xff]  ;;  %s1017_s22 = sshll.u32 %s1416_s21, 3  ;;  %v353_v13 = vld [vmem:[#allocation2 + $0x170] sm:$0xff]  ;;  %v348_v14 = vld [vmem:[#allocation2 + $0x148] sm:$0xff]  ;;  %v357_v3 = vlaneseq  ;;  %s1303_s21 = smov 36   ;;  %vm911_vm8 = vcmask 326656  }
  0x29   : > { %410 = vmatpush1.msra.mxu1 %v343_v4  ;;  %549 = vmatprep.subr.mxu0 %v354_v11  ;;  %v319_v15 = vld [vmem:[#allocation2 + $0x60] sm:$0xff]  ;;  %v314_v17 = vld [vmem:[#allocation2 + $0x38] sm:$0xff]  ;;  %v341_v19 = vld [vmem:[#allocation2 + $0x110] sm:$0xff]  ;;  %s301_s8 = scalar_lea.vmem %s1630_s0, %s1017_s22  ;;  %s305_s9 = scalar_lea.vmem %s1631_s1, %s1017_s22 }
  0x2a   : > { %411 = vmatprep.subr.mxu1 %v338_v5  ;;  %550 = vmatpush1.msra.mxu0 %v353_v13  ;;  %v347_v16 = vld [vmem:[#allocation2 + $0x140] sm:$0xff]  ;;  %v342_v18 = vld [vmem:[#allocation2 + $0x118] sm:$0xff]  ;;  %v313_v20 = vld [vmem:[#allocation2 + $0x30] sm:$0xff]  ;;  %v358_v4 = vshrl.u32 %v357_v3, 7  ;;  %s1016_s20 = sshll.u32 %s295_s19, 3  ;;  %s1026_s23 = sshll.u32 %s1367_s28, 7 }
  0x2b   : > { %412 = vmatpush1.msra.mxu1 %v337_v6  ;;  %551 = vmatprep.subr.mxu0 %v348_v14  ;;  %v336_v21 = vld [vmem:[#allocation2 + $0xe8] sm:$0xff]  ;;  %v335_v23 = vld [vmem:[#allocation2 + $0xe0] sm:$0xff]  ;;  %v330_v25 = vld [vmem:[#allocation2 + $0xb8] sm:$0xff]  ;;  %s297_s29 = scalar_lea.vmem [#allocation5], %s1016_s20  ;;  %s1589_s14 = scalar_lea.hbm %s1637_s7, %s1026_s23 }
  0x2c   : > { %413 = vmatprep.subr.mxu1 %v332_v7  ;;  %552 = vmatpush1.msra.mxu0 %v347_v16  ;;  %v308_v22 = vld [vmem:[#allocation2 + $0x8] sm:$0xff]  ;;  %v307_v24 = vld [vmem:[#allocation2] sm:$0xff]  ;;  %v329_v29 = vld [vmem:[#allocation2 + $0xb0] sm:$0xff]  ;;  %v359_v5 = vsub.s32 0, %v358_v4  ;;  %v371_v16 = vsub.s32 3, %v358_v4  ;;  %s914_s28 = scalar_lea.sflag [#allocation4], %s295_s19 }
  0x2d   : > { %414 = vmatpush1.msra.mxu1 %v331_v8  ;;  %553 = vmatprep.subr.mxu0 %v342_v18  ;;  %v306_v26 = vld [vmem:[%s301_s8] sm:$0xff]  ;;  %v352_v27 = vld [vmem:[#allocation2 + $0x168] sm:$0xff]  ;;  %v346_v30 = vld [vmem:[#allocation2 + $0x138] sm:$0xff]  ;;  %v363_v8 = vsub.s32 1, %v358_v4  ;;  %s927_s8 = sshll.u32 %s297_s29, 4  ;;  %s1305_s22 = smov [#allocation5]   ;;  %s1591_s8 = int_to_ptr.vmem [resolvable:$true] %s927_s8 }
  0x2e   : > { %415 = vmatprep.subr.mxu1 %v326_v9  ;;  %554 = vmatpush1.msra.mxu0 %v341_v19  ;;  %v351_v28 = vld [vmem:[#allocation2 + $0x160] sm:$0xff]  ;;  %v324_v31 = vld [vmem:[#allocation2 + $0x88] sm:$0xff]  ;;  %v345_v32 = vld [vmem:[#allocation2 + $0x130] sm:$0xff]  ;;  %s1236_s15 = sshll.u32 %s1305_s22, 4  ;;  %s1237_s15 = int_to_ptr.vmem [resolvable:$false] %s1236_s15 }
  0x2f   : > { %416 = vmatpush1.msra.mxu1 %v325_v10  ;;  %555 = vmatprep.subr.mxu0 %v336_v21  ;;  %v340_v33 = vld [vmem:[#allocation2 + $0x108] sm:$0xff]  ;;  %v323_v34 = vld [vmem:[#allocation2 + $0x80] sm:$0xff]  ;;  %v318_v36 = vld [vmem:[#allocation2 + $0x58] sm:$0xff]  ;;  %p1239_p11 = scmp.lt.s32.totalorder %s1591_s8, %s1237_s15 }
  0x30   : > { %417 = vmatprep.subr.mxu1 %v320_v12  ;;  %556 = vmatpush1.msra.mxu0 %v335_v23  ;;  %v339_v35 = vld [vmem:[#allocation2 + $0x100] sm:$0xff]  ;;  %v334_v37 = vld [vmem:[#allocation2 + $0xd8] sm:$0xff]  ;;  %v317_v38 = vld [vmem:[#allocation2 + $0x50] sm:$0xff] }
  0x31   : > { %418 = vmatpush1.msra.mxu1 %v319_v15  ;;  %557 = vmatprep.subr.mxu0 %v330_v25  ;;  %v333_v39 = vld [vmem:[#allocation2 + $0xd0] sm:$0xff]  ;;  %v312_v40 = vld [vmem:[#allocation2 + $0x28] sm:$0xff]  ;;  %v311_v42 = vld [vmem:[#allocation2 + $0x20] sm:$0xff] }
  0x32   : > { %419 = vmatprep.subr.mxu1 %v314_v17  ;;  %558 = vmatpush1.msra.mxu0 %v329_v29  ;;  %v328_v41 = vld [vmem:[#allocation2 + $0xa8] sm:$0xff]  ;;  %v327_v43 = vld [vmem:[#allocation2 + $0xa0] sm:$0xff]  ;;  %v322_v44 = vld [vmem:[#allocation2 + $0x78] sm:$0xff]  ;;  %v367_v17 = vsub.s32 2, %v358_v4 }
  0x33   : > { %420 = vmatpush1.msra.mxu1 %v313_v20  ;;  %559 = vmatprep.subr.mxu0 %v324_v31  ;;  %v321_v45 = vld [vmem:[#allocation2 + $0x70] sm:$0xff]  ;;  %v316_v46 = vld [vmem:[#allocation2 + $0x48] sm:$0xff]  ;;  %v315_v47 = vld [vmem:[#allocation2 + $0x40] sm:$0xff] }
  0x34   : > { %421 = vmatprep.subr.mxu1 %v308_v22  ;;  %560 = vmatpush1.msra.mxu0 %v323_v34  ;;  %v310_v48 = vld [vmem:[#allocation2 + $0x18] sm:$0xff]  ;;  %v309_v49 = vld [vmem:[#allocation2 + $0x10] sm:$0xff]  ;;  %v633_v52 = vld [vmem:[%s1634_s4 + $0x68] sm:$0xff] }
  0x35   : > { %422 = vmatpush1.msra.mxu1 %v307_v24  ;;  %561 = vmatprep.subr.mxu0 %v318_v36  ;;  %v635_v50 = vld [vmem:[%s1634_s4 + $0x78] sm:$0xff]  ;;  %v634_v51 = vld [vmem:[%s1634_s4 + $0x70] sm:$0xff]  ;;  %v632_v53 = vld [vmem:[%s1634_s4 + $0x60] sm:$0xff] }
  0x36   : > { %1019 = vmatmul.mubr.msk.f32.vlgmr.msra.gmra.mxu1 %vm387_vm0, %v306_v26  ;;  %478 = vmatprep.subr.mxu1 %v352_v27  ;;  %v631_v54 = vld [vmem:[%s1634_s4 + $0x58] sm:$0xff]  ;;  %v630_v55 = vld [vmem:[%s1634_s4 + $0x50] sm:$0xff]  ;;  %v629_v56 = vld [vmem:[%s1634_s4 + $0x48] sm:$0xff] }
  0x37   : > { %479 = vmatpush1.msra.mxu1 %v351_v28  ;;  %526 = vmatprep.mubr.f32.mxu1 %v1301_v0  ;;  %v628_v57 = vld [vmem:[%s1634_s4 + $0x40] sm:$0xff]  ;;  %v627_v58 = vld [vmem:[%s1634_s4 + $0x38] sm:$0xff]  ;;  %v626_v59 = vld [vmem:[%s1634_s4 + $0x30] sm:$0xff] }
  0x38   : > { %480 = vmatprep.subr.mxu1 %v346_v30  ;;  %562 = vmatpush1.msra.mxu0 %v317_v38  ;;  %v625_v60 = vld [vmem:[%s1634_s4 + $0x28] sm:$0xff]  ;;  %v624_v61 = vld [vmem:[%s1634_s4 + $0x20] sm:$0xff]  ;;  %v623_v62 = vld [vmem:[%s1634_s4 + $0x18] sm:$0xff]  ;;  %v379_v30 = vsub.s32 5, %v358_v4 }
  0x39   : > { %481 = vmatpush1.msra.mxu1 %v345_v32  ;;  %563 = vmatprep.subr.mxu0 %v312_v40  ;;  %v622_v63 = vld [vmem:[%s1634_s4 + $0x10] sm:$0xff]  ;;  %v621_v1 = vld [vmem:[%s1634_s4 + $0x8] sm:$0xff]  ;;  %v620_v2 = vld [vmem:[%s1634_s4] sm:$0xff] }
  0x3a   : > { %482 = vmatprep.subr.mxu1 %v340_v33  ;;  %564 = vmatpush1.msra.mxu0 %v311_v42  ;;  %v355_v6 = vld [vmem:[%s1633_s3] sm:$0x3f] }
  0x3b   : > { %483 = vmatpush1.msra.mxu1 %v339_v35  ;;  %1021 = vmatmul.mubr.msk.f32.vlgmr.msra.gmra.mxu0 %vm387_vm0, %v306_v26  ;;  %v360_v7 = vrot.slane %v355_v6, %v359_v5  ;;  %v364_v12 = vrot.slane %v355_v6, %v363_v8  ;;  %v372_v19 = vrot.slane %v355_v6, %v371_v16  ;;  %v375_v35 = vsub.s32 4, %v358_v4  ;;  %v829_v4 = vld [vmem:[%s1636_s6 + $0x78] sm:$0xff]  ;;  %v828_v5 = vld [vmem:[%s1636_s6 + $0x70] sm:$0xff]  ;;  %v819_v16 = vld [vmem:[%s1636_s6 + $0x28] sm:$0xff] }
  0x3c   : > { %484 = vmatprep.subr.mxu1 %v334_v37  ;;  %1100 = vmatprep.subr.mxu0 %v1301_v0  ;;  %v368_v22 = vrot.slane %v355_v6, %v367_v17  ;;  %v380_v33 = vrot.slane %v355_v6, %v379_v30  ;;  %v825_v8 = vld [vmem:[%s1636_s6 + $0x58] sm:$0xff]  ;;  %v818_v17 = vld [vmem:[%s1636_s6 + $0x20] sm:$0xff] }
  0x3d   : > { %485 = vmatpush1.msra.mxu1 %v333_v39  ;;  %1102 = vmatprep.mubr.msk.f32.mxu0 %vm1302_vm1, %v1301_v0  ;;  %v376_v38 = vrot.slane %v355_v6, %v375_v35  ;;  %v827_v6 = vld [vmem:[%s1636_s6 + $0x68] sm:$0xff] }
  0x3e   : > { %486 = vmatprep.subr.mxu1 %v328_v41 }
  0x3f   : > { %487 = vmatpush1.msra.mxu1 %v327_v43 }
  0x40   : > { %488 = vmatprep.subr.mxu1 %v322_v44 }
  0x41   : > { %489 = vmatpush1.msra.mxu1 %v321_v45 }
  0x42   : > { %490 = vmatprep.subr.mxu1 %v316_v46  ;;  %v718_v46 = vld [vmem:[%s305_s9] sm:$0xff] }
  0x43   : > { %491 = vmatpush1.msra.mxu1 %v315_v47 }
  0x44   : > { %492 = vmatprep.subr.mxu1 %v310_v48 }
  0x45   : > { %493 = vmatpush1.msra.mxu1 %v309_v49 }
  0x46   : > { %1020 = vmatmul.mubr.msk.f32.vlgmr.msra.gmra.mxu1 %vm387_vm0, %v306_v26  ;;  %1065 = vmatprep.subr.mxu1 %v1301_v0 }
  0x47   : > { %1066 = vmatpush3.msra.mxu1 %v635_v50  ;;  %1097 = vmatprep.mubr.msk.f32.mxu1 %vm1302_vm1, %v1301_v0 }
  0x48   : > { %1067 = vmatprep.subr.mxu1 %v1301_v0 }
  0x49   : > { %1068 = vmatpush3.msra.mxu1 %v634_v51 }
  0x4a   : > { %1069 = vmatprep.subr.mxu1 %v1301_v0 }
  0x4b   : > { %1070 = vmatpush3.msra.mxu1 %v633_v52 }
  0x4c   : > { %1071 = vmatprep.subr.mxu1 %v1301_v0 }
  0x4d   : > { %1072 = vmatpush3.msra.mxu1 %v632_v53  ;;  %v735_v53 = vld [vmem:[%s1635_s5] sm:$0xf] }
  0x4e   : > { %1073 = vmatprep.subr.mxu1 %v1301_v0  ;;  %1101 = vmatpush3.msk.msra.mxu0 %vm739_vm3, %v735_v53 }
  0x4f   : > { %1074 = vmatpush3.msra.mxu1 %v631_v54  ;;  %1105 = vmatprep.subr.mxu0 %v1301_v0  ;;  %v725_v54 = vand.u32 127, %v357_v3 }
  0x50   : > { %1075 = vmatprep.subr.mxu1 %v1301_v0 }
  0x51   : > { %1076 = vmatpush3.msra.mxu1 %v630_v55 }
  0x52   : > { %1077 = vmatprep.subr.mxu1 %v1301_v0 }
  0x53   : > { %1078 = vmatpush3.msra.mxu1 %v629_v56 }
  0x54   : > { %1079 = vmatprep.subr.mxu1 %v1301_v0 }
  0x55   : > { %1080 = vmatpush3.msra.mxu1 %v628_v57  ;;  %v726_v57 = vcvt.s32.f32 %v725_v54 }
  0x56   : > { %1081 = vmatprep.subr.mxu1 %v1301_v0 }
  0x57   : > { %1082 = vmatpush3.msra.mxu1 %v627_v58 }
  0x58   : > { %1083 = vmatprep.subr.mxu1 %v1301_v0 }
  0x59   : > { %1084 = vmatpush3.msra.mxu1 %v626_v59 }
  0x5a   : > { %1085 = vmatprep.subr.mxu1 %v1301_v0 }
  0x5b   : > { %1086 = vmatpush3.msra.mxu1 %v625_v60 }
  0x5c   : > { %1087 = vmatprep.subr.mxu1 %v1301_v0 }
  0x5d   : > { %1088 = vmatpush3.msra.mxu1 %v624_v61 }
  0x5e   : > { %1089 = vmatprep.subr.mxu1 %v1301_v0 }
  0x5f   : > { %1090 = vmatpush3.msra.mxu1 %v623_v62 }
  0x60   : > { %1091 = vmatprep.subr.mxu1 %v1301_v0 }
  0x61   : > { %1092 = vmatpush3.msra.mxu1 %v622_v63 }
  0x62   : > { %1093 = vmatprep.subr.mxu1 %v1301_v0 }
  0x63   : > { %1094 = vmatpush3.msra.mxu1 %v621_v1 }
  0x64   : > { %1095 = vmatprep.subr.mxu1 %v1301_v0 }
  0x65   : > { %1096 = vmatpush3.msra.mxu1 %v620_v2 }
  0xf6   : > { %v457_v9 = vpop.f32.mrf.mxu1 }
  0xf7   : > { %v458_v10 = vadd.f32 %v457_v9, %v360_v7  ;;  %v826_v7 = vld [vmem:[%s1636_s6 + $0x60] sm:$0xff]  ;;  %v824_v9 = vld [vmem:[%s1636_s6 + $0x50] sm:$0xff] }
  0xf8   : > { %v459_v13 = vpop.f32.mrf.mxu1 }
  0xf9   : > { %v604_v11 = vmul.f32 0.5, %v458_v10  ;;  %v460_v14 = vadd.f32 %v459_v13, %v364_v12  ;;  %v823_v10 = vld [vmem:[%s1636_s6 + $0x48] sm:$0xff]  ;;  %v822_v13 = vld [vmem:[%s1636_s6 + $0x40] sm:$0xff] }
  0xfb   : > { %1196 = vtanh.f32 %v604_v11  ;;  %v605_v15 = vmul.f32 0.5, %v460_v14  ;;  %v599_v31 = vpop.f32.mrf.mxu0  ;;  %v821_v14 = vld [vmem:[%s1636_s6 + $0x38] sm:$0xff] }
  0xfc   : > { %v600_v43 = vadd.f32 %v599_v31, %v376_v38 }
  0xfd   : > { %1198 = vtanh.f32 %v605_v15  ;;  %v601_v34 = vpop.f32.mrf.mxu0  ;;  %v820_v15 = vld [vmem:[%s1636_s6 + $0x30] sm:$0xff] }
  0xfe   : > { %v602_v37 = vadd.f32 %v601_v34, %v380_v33 }
 0x106   : > { %v528_v18 = vpop.f32.mrf.mxu1 }
 0x107   : > { %v529_v26 = vadd.f32 %v528_v18, %v368_v22  ;;  %v817_v18 = vld [vmem:[%s1636_s6 + $0x18] sm:$0xff] }
 0x108   : > { %v1197_v20 = vpop.eup %1196  ;;  %v530_v21 = vpop.f32.mrf.mxu1 }
 0x109   : > { %v608_v23 = vadd.f32 1.0, %v1197_v20  ;;  %v531_v24 = vadd.f32 %v530_v21, %v372_v19  ;;  %v816_v19 = vld [vmem:[%s1636_s6 + $0x10] sm:$0xff]  ;;  %v815_v20 = vld [vmem:[%s1636_s6 + $0x8] sm:$0xff]  ;;  %v814_v21 = vld [vmem:[%s1636_s6] sm:$0xff] }
 0x10a   : > { %v1199_v29 = vpop.eup %1198 }
 0x10b   : > { %v610_v25 = vmul.f32 0.5, %v608_v23  ;;  %v609_v32 = vadd.f32 1.0, %v1199_v29 }
 0x10d   : > { %v612_v27 = vmul.f32 %v610_v25, %v531_v24  ;;  %v611_v36 = vmul.f32 0.5, %v609_v32 }
 0x10f   : > { %v613_v28 = vadd.f32 %v612_v27, %v529_v26  ;;  %v615_v39 = vsub.f32 1.0, %v611_v36  ;;  %v617_v42 = vmul.f32 %v611_v36, %v602_v37 }
 0x111   : > { %1200 = vtanh.f32 %v613_v28 }
 0x11e   : > { %v1201_v40 = vpop.eup %1200 }
 0x11f   : > { %v616_v41 = vmul.f32 %v1201_v40, %v615_v39 }
 0x121   : > { %v1500_v44 = vadd.f32 %v617_v42, %v616_v41 }
 0x123   : > { %v619_v45 = vmul.f32 %v1500_v44, %v600_v43 }
 0x125   : > { %1098 = vmatmul.mubr.f32.vlgmr.msra.gmra.mxu1 %v619_v45 }
 0x1e5   : > { %v702_v47 = vpop.f32.mrf.mxu1 }
 0x1e6   : > { %v707_v48 = vsel %vm706_vm2, %v702_v47, -inf  ;;  %v719_v49 = vadd.f32 %v718_v46, %v702_v47 }
 0x1e7   : > { %708 = vmax.xlane.f32.xlu1 %v707_v48  ;;  %v1099_v50 = vpop.f32.mrf.mxu1 }
 0x1e8   : > { %v720_v51 = vmul.f32 2.0, %v719_v49 }
 0x1ea   : > { %v721_v52 = vsel %vm706_vm2, %v720_v51, -inf }
 0x1eb   : > { %722 = vmax.xlane.f32.xlu0 %v721_v52 }
 0x270   : > { %v709_v55 = vpop.xlane.xlu1 %708 }
 0x271   : > { %v710_v56 = vsub.f32 %v702_v47, %v709_v55 }
 0x273   : > { %v711_v58 = vmul.f32 1.442695, %v710_v56 }
 0x274   : > { %v723_v59 = vpop.xlane.xlu0 %722 }
 0x275   : > { %1202 = vpow2.f32 %v711_v58  ;;  %vm727_vm4 = vcmp.ge.f32.partialorder %v720_v51, %v723_v59 }
 0x276   : > { %v728_v60 = vsel %vm727_vm4, %v726_v57, 4.0 }
 0x277   : > { %v729_v61 = vsel %vm706_vm2, %v728_v60, inf }
 0x278   : > { %730 = vmin.xlane.f32.xlu0 %v729_v61 }
 0x282   : > { %v1203_v62 = vpop.eup %1202 }
 0x283   : > { %v713_v63 = vsel %vm706_vm2, %v1203_v62, 0.0 }
 0x284   : > { %714 = vadd.xlane.f32.xlu1 %v713_v63 }
 0x301   : > { %v731_v1 = vpop.xlane.xlu0 %730 }
 0x302   : > { %vm732_vm5 = vcmp.eq.f32.partialorder %v726_v57, %v731_v1 }
 0x303   : > { %v1022_v2 = vsel %vm732_vm5, 1.0, %v1301_v0 }
 0x304   : > { %1103 = vmatmul.mubr.msk.f32.vlgmr.msra.gmra.mxu0 %vm706_vm2, %v1022_v2  ;;  %904 = vrot.lane.b32.xlu1 %v1022_v2, %s1303_s21  ;;  %s1232_s21 = scalar_lea.vmem %s1591_s8, 128 }
 0x305   : > { %1137 = vmatprep.mubr.msk.f32.mxu0 %vm1302_vm1, %v1301_v0  ;;  %1106 = vmatpush3.msra.mxu0 %v829_v4  ;;  %p1233_p8 = scmp.ne.s32.totalorder %s1591_s8, %s1232_s21 }
 0x306   : > { %1107 = vmatprep.subr.mxu0 %v1301_v0 }
 0x307   : > { %1108 = vmatpush3.msra.mxu0 %v828_v5  ;;  %p1234_p9 = pnand %p1233_p8, %p1384_p5 }
 0x308   : > { %1109 = vmatprep.subr.mxu0 %v1301_v0 }
 0x309   : > { %1110 = vmatpush3.msra.mxu0 %v827_v6  ;;  %p1235_p10 = pneg %p1234_p9 }
 0x30a   : > { %1111 = vmatprep.subr.mxu0 %v1301_v0 }
 0x30b   : > { %1112 = vmatpush3.msra.mxu0 %v826_v7 }
 0x30c   : > { %1113 = vmatprep.subr.mxu0 %v1301_v0 }
 0x30d   : > { %v715_v3 = vpop.xlane.xlu1 %714  ;;  %1114 = vmatpush3.msra.mxu0 %v825_v8 }
 0x30e   : > { %1204 = vrcp.f32 %v715_v3  ;;  %1115 = vmatprep.subr.mxu0 %v1301_v0 }
 0x30f   : > { %1116 = vmatpush3.msra.mxu0 %v824_v9 }
 0x310   : > { %1117 = vmatprep.subr.mxu0 %v1301_v0 }
 0x311   : > { %1118 = vmatpush3.msra.mxu0 %v823_v10 }
 0x312   : > { %1119 = vmatprep.subr.mxu0 %v1301_v0 }
 0x313   : > { %1120 = vmatpush3.msra.mxu0 %v822_v13 }
 0x314   : > { %1121 = vmatprep.subr.mxu0 %v1301_v0 }
 0x315   : > { %1122 = vmatpush3.msra.mxu0 %v821_v14 }
 0x316   : > { %1123 = vmatprep.subr.mxu0 %v1301_v0 }
 0x317   : > { %1124 = vmatpush3.msra.mxu0 %v820_v15 }
 0x318   : > { %1125 = vmatprep.subr.mxu0 %v1301_v0 }
 0x319   : > { %1126 = vmatpush3.msra.mxu0 %v819_v16 }
 0x31a   : > { %1127 = vmatprep.subr.mxu0 %v1301_v0 }
 0x31b   : > { %v1205_v11 = vpop.eup %1204  ;;  %1128 = vmatpush3.msra.mxu0 %v818_v17 }
 0x31c   : > { %v717_v12 = vmul.f32 %v1205_v11, %v1203_v62  ;;  %1129 = vmatprep.subr.mxu0 %v1301_v0 }
 0x31d   : > { %1130 = vmatpush3.msra.mxu0 %v817_v18 }
 0x31e   : > { %901 = vrot.lane.b32.xlu0 %v717_v12, %s1304_s16  ;;  %1131 = vmatprep.subr.mxu0 %v1301_v0  ;;  %s1238_s16 = scalar_lea.vmem %s1237_s15, 256 }
 0x31f   : > { %1132 = vmatpush3.msra.mxu0 %v816_v19  ;;  %p1240_p12 = scmp.lt.s32.totalorder %s1238_s16, %s1232_s21 }
 0x320   : > { %1133 = vmatprep.subr.mxu0 %v1301_v0 }
 0x321   : > { %1134 = vmatpush3.msra.mxu0 %v815_v20  ;;  %p1241_p13 = por %p1240_p12, %p1239_p11 }
 0x322   : > { %1135 = vmatprep.subr.mxu0 %v1301_v0 }
 0x323   : > { %1136 = vmatpush3.msra.mxu0 %v814_v21  ;;  %p1242_p0 = pnand %p1241_p13, %p1235_p10 }
 0x376   : > { %v905_v26 = vpop.permute.xlu1 %904 }
 0x390   : > { %v902_v25 = vpop.permute.xlu0 %901 }
 0x3c4   : > { %v809_v22 = vpop.f32.mrf.mxu0 }
 0x3c5   : > { %v813_v23 = vmul.f32 %v809_v22, %v1500_v44 }
 0x3c6   : > { %v1104_v24 = vpop.f32.mrf.mxu0 }
 0x3c7   : > { %1138 = vmatmul.mubr.f32.vlgmr.msra.gmra.mxu0 %v813_v23 }
 0x487   : > { %v896_v0 = vpop.f32.mrf.mxu0 }
 0x488   : > { %v908_v27 = vsel %vm907_vm6, %v896_v0, %v902_v25 }
 0x489   : > { %v910_v28 = vsel %vm909_vm7, %v908_v27, %v905_v26  ;;  %v1139_v29 = vpop.f32.mrf.mxu0 }
 0x48a   : > { %912 = vst.msk [vmem:[%s297_s29] sm:$0xff] %vm911_vm8, %v910_v28 }
 0x48b   : > { %1245 = shalt.err (!%p1242_p0)
}
 0x48c   : > { %s1246_s17 = scalar_lea.hbm %s1589_s14, 128  ;;  %s1250_s20 = scalar_lea.hbm %s1637_s7, 256 }
 0x48d   : > { %p1247_p1 = scmp.ne.s32.totalorder %s1589_s14, %s1246_s17  ;;  %p1251_p4 = scmp.lt.s32.totalorder %s1589_s14, %s1637_s7 }
 0x48e   : > { %p1252_p7 = scmp.lt.s32.totalorder %s1250_s20, %s1246_s17 }
 0x48f   : > { %p1248_p2 = pnand %p1247_p1, %p1384_p5 }
 0x490   : > { %p1253_p6 = por %p1252_p7, %p1251_p4 }
 0x491   : > { %p1249_p3 = pneg %p1248_p2 }
 0x493   : > { %p1254_p8 = pnand %p1253_p6, %p1249_p3 }
 0x495   : > { %1257 = shalt.err (!%p1254_p8)
}
 0x496   : > { %1144 = dma.vmem_to_hbm [thread:$0]  (%p1384_p5), %s1591_s8, 128, %s1589_s14, %s914_s28  }
 0x497 PF: > { %p1156_p9 = scmp.ge.s32.totalorder %s1296_s27, 2  ;;  %s939_s9 = sand.u32 1, %s1284_s24  }
 0x498   : > { %p1641_p10 = scmp.ne.s32.totalorder %s1639_s12, 0  ;;  %s940_s13 = scalar_lea.sflag [#allocation4], %s939_s9 }
 0x49a   : > { %p1151_p11 = pnand %p1156_p9, %p1641_p10 }
 0x49c   : > { %p1152_p12 = pneg %p1151_p11 }
 0x49e   : > { %1279 = dma.done.wait (%p1152_p12), %s940_s13, 128  }
 0x49f   : > { %1281 = vsyncadd (%p1152_p12), %s940_s13, 4294967168  ;;  %p18_p13 = scmp.ge.s32.totalorder %s1371_s30, 4   ;;  %s1642_s24 = smov %s1288_s25 }
 0x4a0   : > { %s1643_s25 = smov %s1292_s26  ;;  %s1644_s26 = smov %s1382_s10 }
 0x4a1   : > { %s1645_s27 = smov %s1371_s30  ;;  %20 = sbr.rel (!%p18_p13) target bundleno = 4 (0x4), region = 91 }
 0x4a6   :  { %945 = vsyncpa [#allocation3], 1 }
 0x4a7   :  { %947 = vsyncpa [#allocation3 + $0x1], 1 }
 0x4a8   :  { %948 = vsyncpa [#allocation4], 1 }
 0x4a9   :  { %950 = vsyncpa [#allocation4 + $0x1], 1 }

</bundles_post_ra>
